<compile_context>
chip_gen: v7x
topology: tpu7x:2x2x1
jax: 0.10.0
libtpu: 0.0.40
codegen_flags: <defaults>
</compile_context>

<pallas_src>
import jax
import jax.numpy as jnp
from jax import lax
from jax.experimental import pallas as pl
from jax.experimental.pallas import tpu as pltpu


def _round_up(x, m):
    return (x + m - 1) // m * m


def _sigmoid(v):
    return 1.0 / (1.0 + jnp.exp(-v))


def _compiler_params(resident_bytes, dims):
    # size the scoped VMEM limit from the actual resident buffers (>= default,
    # capped at v7x's 64 MiB physical VMEM).
    limit = int(min(max(2 * resident_bytes, 32 * 1024 * 1024), 64 * 1024 * 1024))
    return pltpu.CompilerParams(dimension_semantics=dims,
                                vmem_limit_bytes=limit)


# --------------------------------------------------------------------------
# Kernel 1: shared row-tiled matmul + bias  (bf16 in, f32 accumulate)
# --------------------------------------------------------------------------
def _matmul_bias_kernel(x_ref, w_ref, b_ref, o_ref):
    o_ref[...] = (jnp.dot(x_ref[...], w_ref[...],
                          preferred_element_type=jnp.float32)
                  + b_ref[...]).astype(o_ref.dtype)


def _matmul_bias(x2d, w, b, *, out_dtype, mm_dtype):
    """(M, Kd) @ (Kd, N) + (1, N).  Rows padded to 8 and tiled (TM <= 512)."""
    M, Kd = x2d.shape
    N = w.shape[1]
    x2d = x2d.astype(mm_dtype)
    w = w.astype(mm_dtype)
    b = b.astype(jnp.float32)

    m8 = _round_up(M, 8)
    TM = 512 if m8 >= 512 else m8          # 512-row tiles ~85% of HBM roofline
    Mp = _round_up(m8, TM)
    if Mp != M:
        x2d = jnp.pad(x2d, ((0, Mp - M), (0, 0)))

    in_sz = jnp.dtype(mm_dtype).itemsize
    out_sz = jnp.dtype(out_dtype).itemsize
    resident = 2 * TM * (Kd * in_sz + N * out_sz) + Kd * N * in_sz + N * 4

    out = pl.pallas_call(
        _matmul_bias_kernel,
        out_shape=jax.ShapeDtypeStruct((Mp, N), out_dtype),
        grid=(Mp // TM,),
        in_specs=[pl.BlockSpec((TM, Kd), lambda i: (i, 0)),
                  pl.BlockSpec((Kd, N), lambda i: (0, 0)),
                  pl.BlockSpec((1, N), lambda i: (0, 0))],
        out_specs=pl.BlockSpec((TM, N), lambda i: (i, 0)),
        compiler_params=_compiler_params(resident, ("parallel",)),
    )(x2d, w, b)
    return out if Mp == M else out[:M]


# --------------------------------------------------------------------------
# Kernel 2: fused bidirectional LSTM recurrence, streamed over L-chunks.
#   gin_ref : (C, B, 4H) bf16, time-interleaved (fwd gates of t | bwd gates of
#             L-1-t), bias already included.
#   m_ref   : (C, B, H) f32, fused mask (fwd lanes | flipped bwd lanes)
#   whc_ref : (H, 4H) f32 block-diagonal recurrent weights
#   out_ref : (C, B, H) f32, bwd lanes hold time-reversed outputs
#   h_sc/c_sc persist across grid steps (grid axis is "arbitrary" / sequential).
# --------------------------------------------------------------------------
def _bilstm_kernel(gin_ref, m_ref, whc_ref, out_ref, h_sc, c_sc):
    C = gin_ref.shape[0]
    H = out_ref.shape[2]

    @pl.when(pl.program_id(0) == 0)
    def _():
        h_sc[...] = jnp.zeros_like(h_sc)
        c_sc[...] = jnp.zeros_like(c_sc)

    def body(j, carry):
        gates = (gin_ref[j].astype(jnp.float32)
                 + jnp.dot(h_sc[...], whc_ref[...],
                           preferred_element_type=jnp.float32))
        i_g = _sigmoid(gates[:, 0:H])
        f_g = _sigmoid(gates[:, H:2 * H])
        g_g = jnp.tanh(gates[:, 2 * H:3 * H])
        o_g = _sigmoid(gates[:, 3 * H:4 * H])
        c_new = f_g * c_sc[...] + i_g * g_g
        h_new = o_g * jnp.tanh(c_new)

        # padded positions: keep state, emit zeros (pack_padded_sequence behavior)
        m = m_ref[j]                                      # (B, H) fused mask
        upd = m > 0.0
        c_sc[...] = jnp.where(upd, c_new, c_sc[...])
        h_sc[...] = jnp.where(upd, h_new, h_sc[...])
        out_ref[pl.ds(j, 1), :, :] = (h_sc[...] * m)[None]   # one full-width store
        return carry

    lax.fori_loop(0, C, body, 0, unroll=4)


def _bilstm(gin_fused, mask_fused, whc, chunk):
    Lp, B, G4 = gin_fused.shape
    H = G4 // 4
    n_chunks = Lp // chunk
    gin_sz = jnp.dtype(gin_fused.dtype).itemsize
    resident = (2 * chunk * B * (G4 * gin_sz + H * 4 + H * 4)
                + H * G4 * 4 + 2 * B * H * 4)
    return pl.pallas_call(
        _bilstm_kernel,
        out_shape=jax.ShapeDtypeStruct((Lp, B, H), jnp.float32),
        grid=(n_chunks,),
        in_specs=[pl.BlockSpec((chunk, B, G4), lambda i: (i, 0, 0)),
                  pl.BlockSpec((chunk, B, H), lambda i: (i, 0, 0)),
                  pl.BlockSpec((H, G4), lambda i: (0, 0))],
        out_specs=pl.BlockSpec((chunk, B, H), lambda i: (i, 0, 0)),
        scratch_shapes=[pltpu.VMEM((B, H), jnp.float32),
                        pltpu.VMEM((B, H), jnp.float32)],
        compiler_params=_compiler_params(resident, ("arbitrary",)),
    )(gin_fused, mask_fused, whc)


# --------------------------------------------------------------------------
# Kernel 3: span representations — pure VPU (both projections hoisted).
#   proj_ref: (Lsp + K, 2H) f32 with rows >= L zero-padded
#             ([:, :H] = tok@Ws, [:, H:] = tok@We)
#   wb_ref  : (K, H) width bias (width_emb@Www + span_b)
#   out_ref : (TL, K*H) lane-dense output tile
# --------------------------------------------------------------------------
def _span_rep_kernel(proj_ref, wb_ref, out_ref):
    K, H = wb_ref.shape
    TL = out_ref.shape[0]
    base = pl.multiple_of(pl.program_id(1) * TL, TL)
    start = proj_ref[pl.ds(base, TL), 0:H]
    for w in range(K):                                  # static unroll over widths
        end = proj_ref[pl.ds(base + w, TL), H:2 * H]
        out_ref[:, w * H:(w + 1) * H] = jnp.maximum(
            start + end + wb_ref[w:w + 1, :], 0.0)


def _span_rep(proj_pad, wbias, TL):
    B, LK, H2 = proj_pad.shape
    K, H = wbias.shape
    Lsp = LK - K
    nL = Lsp // TL
    resident = 2 * (LK * H2 * 4 + TL * K * H * 4) + K * H * 4
    return pl.pallas_call(
        _span_rep_kernel,
        out_shape=jax.ShapeDtypeStruct((B * Lsp, K * H), jnp.float32),
        grid=(B, nL),
        in_specs=[pl.BlockSpec((None, LK, H2), lambda b, l: (b, 0, 0)),
                  pl.BlockSpec((K, H), lambda b, l: (0, 0))],
        out_specs=pl.BlockSpec((TL, K * H), lambda b, l: (b * nL + l, 0)),
        compiler_params=_compiler_params(resident, ("parallel", "parallel")),
    )(proj_pad, wbias)


# --------------------------------------------------------------------------
# Parameter re-layout (one-time): fused-gate weights.  Gate k occupies lanes
# [k*H, (k+1)*H); fwd direction in the first Hh lanes of each group, bwd in the
# last Hh.  whc is block-diagonal so fwd/bwd recurrences stay independent.
# --------------------------------------------------------------------------
def _combine_lstm_params(params, H, Hh):
    f32 = jnp.float32
    wif = params["wif"].astype(f32)
    wib = params["wib"].astype(f32)
    whf = params["whf"].astype(f32)
    whb = params["whb"].astype(f32)
    bf = params["bf"].astype(f32)
    bb = params["bb"].astype(f32)
    G = 4 * H

    wx = jnp.concatenate([wif.reshape(H, 4, 1, Hh),
                          wib.reshape(H, 4, 1, Hh)], axis=2).reshape(H, G)
    bc = jnp.concatenate([bf.reshape(1, 4, 1, Hh),
                          bb.reshape(1, 4, 1, Hh)], axis=2).reshape(1, G)

    z = jnp.zeros((Hh, 4, 1, Hh), f32)
    whf_e = jnp.concatenate([whf.reshape(Hh, 4, 1, Hh), z], axis=2).reshape(Hh, G)
    whb_e = jnp.concatenate([z, whb.reshape(Hh, 4, 1, Hh)], axis=2).reshape(Hh, G)
    whc = jnp.concatenate([whf_e, whb_e], axis=0)      # (H, 4H), block-diagonal
    return wx, bc, whc


# --------------------------------------------------------------------------
# Wrapper matching Model.compute_score_train (the part reached by forward())
# --------------------------------------------------------------------------
def model_forward(token_reps, token_masks, params, max_span_width,
                  mm_dtype=jnp.bfloat16):
    # token_reps: (B, L, H) f32 ; token_masks: (B, L) {0,1}
    B, L, H = token_reps.shape
    Hh = H // 2
    K = max_span_width
    f32 = jnp.float32

    wx, bc, whc = _combine_lstm_params(params, H, Hh)

    # ---- 1) hoisted LSTM input projection: one pipelined (L*B, H)@(H, 4H) matmul
    x_lbh = jnp.transpose(token_reps.astype(f32), (1, 0, 2))          # (L, B, H)
    gin2d = _matmul_bias(x_lbh.reshape(L * B, H), wx, bc,
                         out_dtype=mm_dtype, mm_dtype=mm_dtype)       # (L*B, 4H) bf16
    gin = gin2d.reshape(L, B, 4 * H)

    # ---- pre-interleave bwd gates / mask once (amortized over all L serial steps)
    fwd_gate_lane = (jnp.arange(4 * H) % H) < Hh
    gin_fused = jnp.where(fwd_gate_lane[None, None, :], gin, gin[::-1])
    m_lb1 = jnp.transpose(token_masks.astype(f32), (1, 0))[:, :, None]  # (L, B, 1)
    mask_fused = jnp.concatenate(
        [jnp.broadcast_to(m_lb1, (L, B, Hh)),
         jnp.broadcast_to(m_lb1[::-1], (L, B, Hh))], axis=-1)           # (L, B, H)

    # pad time to a chunk multiple (masked steps hold state, emit zeros)
    C = _round_up(L, 8) if L <= 128 else 128
    Lp = _round_up(L, C)
    if Lp != L:
        gin_fused = jnp.pad(gin_fused, ((0, Lp - L), (0, 0), (0, 0)))
        mask_fused = jnp.pad(mask_fused, ((0, Lp - L), (0, 0), (0, 0)))

    # ---- 2) fused bidirectional recurrence, streamed over L-chunks
    out_fused = _bilstm(gin_fused, mask_fused, whc, C)[:L]             # (L, B, H)
    tok_lm = jnp.concatenate([out_fused[:, :, :Hh],
                              out_fused[::-1, :, Hh:]], axis=-1)       # un-flip bwd
    tok_bm = jnp.transpose(tok_lm, (1, 0, 2))                          # (B, L, H)

    # ---- 3) span reps: hoist BOTH projections into one big matmul ([Ws|We])
    wbias = (params["width_emb"].astype(f32) @ params["span_ww"].astype(f32)
             + params["span_b"].astype(f32))                           # (K, H)
    w_cat = jnp.concatenate([params["span_ws"], params["span_we"]], axis=1)
    proj2d = _matmul_bias(tok_bm.reshape(B * L, H), w_cat,
                          jnp.zeros((1, 2 * H), f32),
                          out_dtype=f32, mm_dtype=mm_dtype)            # (B*L, 2H)

    TL = _round_up(L, 8) if L <= 128 else 128
    Lsp = _round_up(L, TL)
    proj_pad = jnp.pad(proj2d.reshape(B, L, 2 * H),
                       ((0, 0), (0, Lsp - L + K), (0, 0)))             # (B, Lsp+K, 2H)
    span2d = _span_rep(proj_pad, wbias, TL)                            # (B*Lsp, K*H)
    span_reps = span2d.reshape(B, Lsp, K, H)[:, :L]                    # (B, L, K, H)

    return dict(span_reps=span_reps,
                token_reps=tok_bm,
                token_masks=token_masks)


# --------------------------------------------------------------------------
# Pure-JAX reference (for correctness check)
# --------------------------------------------------------------------------
def _lstm_dir_ref(x, m, wi, wh, b, reverse):
    L, B, H = x.shape
    Hh = wh.shape[0]

    def step(carry, inp):
        h, c = carry
        x_t, m_t = inp
        gates = x_t @ wi + h @ wh + b
        i = _sigmoid(gates[:, :Hh])
        f = _sigmoid(gates[:, Hh:2 * Hh])
        g = jnp.tanh(gates[:, 2 * Hh:3 * Hh])
        o = _sigmoid(gates[:, 3 * Hh:])
        c_new = f * c + i * g
        h_new = o * jnp.tanh(c_new)
        c = jnp.where(m_t > 0, c_new, c)
        h = jnp.where(m_t > 0, h_new, h)
        return (h, c), h * m_t

    init = (jnp.zeros((B, Hh), jnp.float32), jnp.zeros((B, Hh), jnp.float32))
    xs = (x[::-1], m[::-1]) if reverse else (x, m)
    _, ys = lax.scan(step, init, xs)
    return ys[::-1] if reverse else ys


def model_forward_ref(token_reps, token_masks, params, K):
    x = jnp.transpose(token_reps, (1, 0, 2))                           # (L,B,H)
    m = jnp.transpose(token_masks.astype(jnp.float32), (1, 0))[:, :, None]
    fwd = _lstm_dir_ref(x, m, params["wif"], params["whf"], params["bf"], False)
    bwd = _lstm_dir_ref(x, m, params["wib"], params["whb"], params["bb"], True)
    tok = jnp.concatenate([fwd, bwd], axis=-1)                         # (L,B,H)
    L, B, H = tok.shape
    tok_pad = jnp.concatenate([tok, jnp.zeros((K, B, H), jnp.float32)], axis=0)
    outs = []
    for w in range(K):
        y = (tok_pad[:L] @ params["span_ws"]
             + tok_pad[w:w + L] @ params["span_we"]
             + params["width_emb"][w] @ params["span_ww"]
             + params["span_b"])
        outs.append(jnp.maximum(y, 0.0))
    span = jnp.transpose(jnp.stack(outs, axis=0), (2, 1, 0, 3))        # (B,L,K,H)
    return dict(span_reps=span, token_reps=jnp.transpose(tok, (1, 0, 2)))


# --------------------------------------------------------------------------
if __name__ == "__main__":
    # batch, max_seq_len, hidden, max_span_width, width_embedding_size
    B, L, H, K, We = 2, 12, 128, 4, 64
    Hh = H // 2

    key = jax.random.PRNGKey(0)
    ks = jax.random.split(key, 16)
    sc = 0.1
    params = dict(
        wif=jax.random.normal(ks[0], (H, 4 * Hh), jnp.float32) * sc,
        whf=jax.random.normal(ks[1], (Hh, 4 * Hh), jnp.float32) * sc,
        bf=jax.random.normal(ks[2], (1, 4 * Hh), jnp.float32) * sc,
        wib=jax.random.normal(ks[3], (H, 4 * Hh), jnp.float32) * sc,
        whb=jax.random.normal(ks[4], (Hh, 4 * Hh), jnp.float32) * sc,
        bb=jax.random.normal(ks[5], (1, 4 * Hh), jnp.float32) * sc,
        width_emb=jax.random.normal(ks[6], (K, We), jnp.float32) * sc,
        span_ws=jax.random.normal(ks[7], (H, H), jnp.float32) * sc,
        span_we=jax.random.normal(ks[8], (H, H), jnp.float32) * sc,
        span_ww=jax.random.normal(ks[9], (We, H), jnp.float32) * sc,
        span_b=jax.random.normal(ks[10], (1, H), jnp.float32) * sc,
    )

    token_reps = jax.random.normal(ks[11], (B, L, H), jnp.float32)
    seq_len = jnp.array([L, 7], dtype=jnp.int32)
    token_masks = (jnp.arange(L)[None, :] < seq_len[:, None]).astype(jnp.float32)

    out = model_forward(token_reps, token_masks, params, K)
    jax.block_until_ready(out)

    ref = model_forward_ref(token_reps, token_masks, params, K)
    assert out["span_reps"].shape == (B, L, K, H)
    assert out["token_reps"].shape == (B, L, H)
    # 2e-2 tolerance accounts for bf16 matmul inputs / bf16-stored gates
    # (accumulation and the recurrence state stay f32).
    assert jnp.allclose(out["token_reps"], ref["token_reps"], atol=2e-2, rtol=2e-2)
    assert jnp.allclose(out["span_reps"], ref["span_reps"], atol=2e-2, rtol=2e-2)

    print("KERNEL_OK")
</pallas_src>

<mosaic_0001>
module attributes {stable_mosaic.version = 11 : i64} {
  func.func @_matmul_bias_kernel(%arg0: i32, %arg1: memref<24x128xbf16, #tpu.memory_space<vmem>>, %arg2: memref<128x512xbf16, #tpu.memory_space<vmem>>, %arg3: memref<1x512xf32, #tpu.memory_space<vmem>>, %arg4: memref<24x512xbf16, #tpu.memory_space<vmem>>) attributes {dimension_semantics = [#tpu.dimension_semantics<parallel>], iteration_bounds = array<i64: 1>, scalar_prefetch = 0 : i64, scratch_operands = 0 : i64, tpu.core_type = #tpu.core_type<tc>, window_params = [{transform_indices = @transform_0, window_bounds = array<i64: 24, 128>}, {pipeline_mode = #tpu.pipeline_mode<synchronous>, transform_indices = @transform_1, window_bounds = array<i64: 128, 512>}, {pipeline_mode = #tpu.pipeline_mode<synchronous>, transform_indices = @transform_2, window_bounds = array<i64: 1, 512>}, {transform_indices = @transform_3, window_bounds = array<i64: 24, 512>}]} {
    %c0 = arith.constant 0 : index
    %c0_0 = arith.constant 0 : index
    %0 = vector.load %arg1[%c0, %c0_0] : memref<24x128xbf16, #tpu.memory_space<vmem>>, vector<24x128xbf16>
    %c0_1 = arith.constant 0 : index
    %c0_2 = arith.constant 0 : index
    %1 = vector.load %arg2[%c0_1, %c0_2] : memref<128x512xbf16, #tpu.memory_space<vmem>>, vector<128x512xbf16>
    %cst = arith.constant dense<0.000000e+00> : vector<24x512xf32>
    %2 = tpu.matmul %0, %1, %cst {dimension_numbers = #tpu.dot_dimension_numbers<[1], [0], [0], [1], [0, 0, 1, 1], [], []>} : vector<24x128xbf16>, vector<128x512xbf16>, vector<24x512xf32> -> vector<24x512xf32>
    %c0_3 = arith.constant 0 : index
    %c0_4 = arith.constant 0 : index
    %3 = vector.load %arg3[%c0_3, %c0_4] : memref<1x512xf32, #tpu.memory_space<vmem>>, vector<1x512xf32>
    %4 = vector.broadcast %3 : vector<1x512xf32> to vector<24x512xf32>
    %5 = arith.addf %2, %4 : vector<24x512xf32>
    %6 = arith.truncf %5 : vector<24x512xf32> to vector<24x512xbf16>
    %c0_5 = arith.constant 0 : index
    %c0_6 = arith.constant 0 : index
    %7 = vector.load %arg4[%c0_5, %c0_6] : memref<24x512xbf16, #tpu.memory_space<vmem>>, vector<24x512xbf16>
    tpu.vector_store %arg4[%c0_5, %c0_6], %6 {strides = array<i32>} : memref<24x512xbf16, #tpu.memory_space<vmem>>, vector<24x512xbf16>,
    return
  }
  func.func @transform_0(%arg0: i32) -> (i32, i32) {
    %c0_i32 = arith.constant 0 : i32
    %c0_i32_0 = arith.constant 0 : i32
    return %arg0, %c0_i32 : i32, i32
  }
  func.func @transform_1(%arg0: i32) -> (i32, i32) {
    %c0_i32 = arith.constant 0 : i32
    %c0_i32_0 = arith.constant 0 : i32
    %c0_i32_1 = arith.constant 0 : i32
    return %c0_i32, %c0_i32_0 : i32, i32
  }
  func.func @transform_2(%arg0: i32) -> (i32, i32) {
    %c0_i32 = arith.constant 0 : i32
    %c0_i32_0 = arith.constant 0 : i32
    %c0_i32_1 = arith.constant 0 : i32
    return %c0_i32, %c0_i32_0 : i32, i32
  }
  func.func @transform_3(%arg0: i32) -> (i32, i32) {
    %c0_i32 = arith.constant 0 : i32
    %c0_i32_0 = arith.constant 0 : i32
    return %arg0, %c0_i32 : i32, i32
  }
}

</mosaic_0001>

<bundles_post_ra>
// kernel: tpu_custom_call.1
= control target key start
LH: loop header
LB: loop body
LE: loop exit
PB: predicated region body
PF: predicated region fallthrough
CT: control target
= control target key end

     0   :  { %8 = vsyncpa [#allocation3], 0  ;;  %s690_s0 = inlined_call_operand.hbm [shape: bf16[24,128], index: 0, kind: input, shape index: {}]   ;;  %s691_s1 = inlined_call_operand.hbm [shape: bf16[128,512], index: 1, kind: input, shape index: {}]   ;;  %s692_s2 = inlined_call_operand.vmem [shape: f32[1,512], index: 2, kind: input, shape index: {}]   ;;  %s693_s3 = inlined_call_operand.hbm [shape: bf16[24,512], index: 3, kind: output, shape index: {}]  }
   0x1   :  { %9 = vsyncpa [#allocation6], 0 }
   0x2   :  { %10 = vsyncpa [#allocation4], 0  ;;  %s613_s12 = smov [#allocation2]   ;;  %s541_s16 = scalar_lea.hbm %s690_s0, 192 }
   0x3   :  { %s16_s13 = sshll.u32 %s613_s12, 4  ;;  %p542_p0 = scmp.ne.s32.totalorder %s690_s0, %s541_s16  ;;  %s17_s13 = int_to_ptr.vmem [resolvable:$true] %s16_s13 }
   0x4   :  { %p545_p1 = scmp.lt.u32.totalorder %s541_s16, %s690_s0 }
   0x6   :  { %p547_p2 = pnand %p545_p1, %p542_p0 }
   0x8   :  { %550 = shalt.err (!%p547_p2)
}
   0x9   :  { %s551_s21 = scalar_lea.vmem %s17_s13, 192  ;;  %p556_p4 = scmp.lt.s32.totalorder %s17_s13, %s17_s13 }
   0xa   :  { %p552_p3 = scmp.ne.s32.totalorder %s17_s13, %s551_s21  ;;  %p557_p5 = scmp.lt.s32.totalorder %s551_s21, %s551_s21 }
   0xc   :  { %p558_p6 = por %p557_p5, %p556_p4 }
   0xe   :  { %p559_p7 = pnand %p558_p6, %p552_p3 }
  0x10   :  { %562 = shalt.err (!%p559_p7)
}
  0x11   :  { %s614_s22 = smov 64   ;;  %s615_s23 = smov 4  }
  0x12   :  { %22 = dma.hbm_to_vmem [thread:$0]  %s690_s0, 192, %s17_s13, [#allocation3], %s614_s22, %s614_s22, %s615_s23  }
  0x13   :  { %s616_s26 = smov [#allocation5]   ;;  %s563_s30 = scalar_lea.hbm %s691_s1, 4096 }
  0x14   :  { %s28_s27 = sshll.u32 %s616_s26, 4  ;;  %p564_p8 = scmp.ne.s32.totalorder %s691_s1, %s563_s30  ;;  %s29_s27 = int_to_ptr.vmem [resolvable:$true] %s28_s27 }
  0x15   :  { %p567_p9 = scmp.lt.u32.totalorder %s563_s30, %s691_s1 }
  0x17   :  { %p569_p10 = pnand %p567_p9, %p564_p8 }
  0x19   :  { %572 = shalt.err (!%p569_p10)
}
  0x1a   :  { %s573_s8 = scalar_lea.vmem %s29_s27, 4096  ;;  %p578_p12 = scmp.lt.s32.totalorder %s29_s27, %s29_s27 }
  0x1b   :  { %p574_p11 = scmp.ne.s32.totalorder %s29_s27, %s573_s8  ;;  %p579_p13 = scmp.lt.s32.totalorder %s573_s8, %s573_s8 }
  0x1d   :  { %p580_p0 = por %p579_p13, %p578_p12 }
  0x1f   :  { %p581_p1 = pnand %p580_p0, %p574_p11 }
  0x21   :  { %584 = shalt.err (!%p581_p1)
}
  0x22   :  { %s617_s0 = smov 256   ;;  %s618_s9 = smov 16  }
  0x23   :  { %34 = dma.hbm_to_vmem [thread:$0]  %s691_s1, 4096, %s29_s27, [#allocation6], %s617_s0, %s617_s0, %s618_s9  }
  0x24   :  { %607 = dma.done.wait [#allocation3], 192  }
  0x25   :  { %608 = vsyncadd [#allocation3], 4294967104 }
  0x26   :  { %609 = dma.done.wait [#allocation6], 4096  }
  0x27   :  { %610 = vsyncadd [#allocation6], 4294963200  ;;  %v619_v0 = vmov 0   ;;  %v491_v1 = vld [vmem:[#allocation5 + $0x4] ss:$16 sps:$4 sm:$0xff]   ;;  %v81_v35 = vlaneseq }
  0x28   :  { %303 = vmatprep.mubr.bf16.mxu0 %v619_v0  ;;  %354 = vmatprep.mubr.bf16.mxu1 %v619_v0  ;;  %v493_v2 = vld [vmem:[#allocation5 + $0xc] ss:$16 sps:$4 sm:$0xff]   ;;  %v495_v3 = vld [vmem:[#allocation5] ss:$16 sps:$4 sm:$0xff]   ;;  %v496_v4 = vld [vmem:[#allocation5 + $0x8] ss:$16 sps:$4 sm:$0xff]  }
  0x29   :  { %271 = vmatprep.subr.bf16.mxu0 %v491_v1  ;;  %322 = vmatprep.subr.bf16.mxu1 %v493_v2  ;;  %v497_v5 = vld [vmem:[#allocation5 + $0x24] ss:$16 sps:$4 sm:$0xff]   ;;  %v499_v6 = vld [vmem:[#allocation5 + $0x2c] ss:$16 sps:$4 sm:$0xff]   ;;  %v501_v7 = vld [vmem:[#allocation5 + $0x20] ss:$16 sps:$4 sm:$0xff]  }
  0x2a   :  { %272 = vmatpush1.bf16.msra.mxu0 %v495_v3  ;;  %323 = vmatpush1.bf16.msra.mxu1 %v496_v4  ;;  %v502_v8 = vld [vmem:[#allocation5 + $0x28] ss:$16 sps:$4 sm:$0xff]   ;;  %v503_v9 = vld [vmem:[#allocation5 + $0x44] ss:$16 sps:$4 sm:$0xff]   ;;  %v505_v10 = vld [vmem:[#allocation5 + $0x4c] ss:$16 sps:$4 sm:$0xff]  }
  0x2b   :  { %273 = vmatprep.subr.bf16.mxu0 %v497_v5  ;;  %324 = vmatprep.subr.bf16.mxu1 %v499_v6  ;;  %v507_v11 = vld [vmem:[#allocation5 + $0x40] ss:$16 sps:$4 sm:$0xff]   ;;  %v508_v12 = vld [vmem:[#allocation5 + $0x48] ss:$16 sps:$4 sm:$0xff]   ;;  %v509_v13 = vld [vmem:[#allocation5 + $0x64] ss:$16 sps:$4 sm:$0xff]  }
  0x2c   :  { %v511_v14 = vld [vmem:[#allocation5 + $0x6c] ss:$16 sps:$4 sm:$0xff]   ;;  %v513_v15 = vld [vmem:[#allocation5 + $0x60] ss:$16 sps:$4 sm:$0xff]   ;;  %v514_v16 = vld [vmem:[#allocation5 + $0x68] ss:$16 sps:$4 sm:$0xff]  }
  0x2d   :  { %v515_v17 = vld [vmem:[#allocation5 + $0x84] ss:$16 sps:$4 sm:$0xff]   ;;  %v517_v18 = vld [vmem:[#allocation5 + $0x8c] ss:$16 sps:$4 sm:$0xff]   ;;  %v519_v19 = vld [vmem:[#allocation5 + $0x80] ss:$16 sps:$4 sm:$0xff]  }
  0x2e   :  { %274 = vmatpush1.bf16.msra.mxu0 %v501_v7  ;;  %325 = vmatpush1.bf16.msra.mxu1 %v502_v8  ;;  %v520_v20 = vld [vmem:[#allocation5 + $0x88] ss:$16 sps:$4 sm:$0xff]   ;;  %v521_v21 = vld [vmem:[#allocation5 + $0xa4] ss:$16 sps:$4 sm:$0xff]   ;;  %v523_v22 = vld [vmem:[#allocation5 + $0xac] ss:$16 sps:$4 sm:$0xff]  }
  0x2f   :  { %275 = vmatprep.subr.bf16.mxu0 %v503_v9  ;;  %326 = vmatprep.subr.bf16.mxu1 %v505_v10  ;;  %v525_v23 = vld [vmem:[#allocation5 + $0xa0] ss:$16 sps:$4 sm:$0xff]   ;;  %v526_v24 = vld [vmem:[#allocation5 + $0xa8] ss:$16 sps:$4 sm:$0xff]   ;;  %v527_v25 = vld [vmem:[#allocation5 + $0xc4] ss:$16 sps:$4 sm:$0xff]  }
  0x30   :  { %v529_v26 = vld [vmem:[#allocation5 + $0xcc] ss:$16 sps:$4 sm:$0xff]   ;;  %v531_v27 = vld [vmem:[#allocation5 + $0xc0] ss:$16 sps:$4 sm:$0xff]   ;;  %v532_v28 = vld [vmem:[#allocation5 + $0xc8] ss:$16 sps:$4 sm:$0xff]  }
  0x31   :  { %v533_v29 = vld [vmem:[#allocation5 + $0xe4] ss:$16 sps:$4 sm:$0xff]   ;;  %v535_v30 = vld [vmem:[#allocation5 + $0xec] ss:$16 sps:$4 sm:$0xff]   ;;  %v537_v31 = vld [vmem:[#allocation5 + $0xe0] ss:$16 sps:$4 sm:$0xff]  }
  0x32   :  { %276 = vmatpush1.bf16.msra.mxu0 %v507_v11  ;;  %327 = vmatpush1.bf16.msra.mxu1 %v508_v12  ;;  %v538_v32 = vld [vmem:[#allocation5 + $0xe8] ss:$16 sps:$4 sm:$0xff]   ;;  %v540_v34 = vld [vmem:[#allocation2 + $0x8] ss:$0 sps:$4 sm:$0xff]   ;;  %v82_v36 = vshrl.u32 %v81_v35, 7 }
  0x33   :  { %277 = vmatprep.subr.bf16.mxu0 %v509_v13  ;;  %328 = vmatprep.subr.bf16.mxu1 %v511_v14  ;;  %v539_v33 = vld [vmem:[#allocation2] sm:$0xff]  }
  0x34   :  { %v83_v37 = vsub.s32 0, %v82_v36  ;;  %v91_v38 = vsub.s32 2, %v82_v36  ;;  %v79_v39 = vld [vmem:[%s692_s2] sm:$0xf]  ;;  %v87_v40 = vsub.s32 1, %v82_v36  ;;  %v95_v41 = vsub.s32 3, %v82_v36 }
  0x35   :  { %s620_s2 = smov [#allocation7]  }
  0x36   :  { %278 = vmatpush1.bf16.msra.mxu0 %v513_v15  ;;  %329 = vmatpush1.bf16.msra.mxu1 %v514_v16  ;;  %v84_v42 = vrot.slane %v79_v39, %v83_v37  ;;  %v92_v43 = vrot.slane %v79_v39, %v91_v38  ;;  %v88_v44 = vrot.slane %v79_v39, %v87_v40  ;;  %s424_s13 = sshll.u32 %s620_s2, 4  ;;  %s425_s13 = int_to_ptr.vmem [resolvable:$true] %s424_s13 }
  0x37   :  { %279 = vmatprep.subr.bf16.mxu0 %v515_v17  ;;  %330 = vmatprep.subr.bf16.mxu1 %v517_v18  ;;  %v96_v45 = vrot.slane %v79_v39, %v95_v41  ;;  %s585_s14 = scalar_lea.vmem %s425_s13, 768  ;;  %p590_p3 = scmp.lt.s32.totalorder %s425_s13, %s425_s13 }
  0x38   :  { %p586_p2 = scmp.ne.s32.totalorder %s425_s13, %s585_s14  ;;  %p591_p4 = scmp.lt.s32.totalorder %s585_s14, %s585_s14 }
  0x3a   :  { %280 = vmatpush1.bf16.msra.mxu0 %v519_v19  ;;  %331 = vmatpush1.bf16.msra.mxu1 %v520_v20  ;;  %p592_p5 = por %p591_p4, %p590_p3 }
  0x3b   :  { %281 = vmatprep.subr.bf16.mxu0 %v521_v21  ;;  %332 = vmatprep.subr.bf16.mxu1 %v523_v22 }
  0x3c   :  { %p593_p6 = pnand %p592_p5, %p586_p2 }
  0x3e   :  { %282 = vmatpush1.bf16.msra.mxu0 %v525_v23  ;;  %333 = vmatpush1.bf16.msra.mxu1 %v526_v24 }
  0x3f   :  { %283 = vmatprep.subr.bf16.mxu0 %v527_v25  ;;  %334 = vmatprep.subr.bf16.mxu1 %v529_v26 }
  0x42   :  { %284 = vmatpush1.bf16.msra.mxu0 %v531_v27  ;;  %335 = vmatpush1.bf16.msra.mxu1 %v532_v28 }
  0x43   :  { %285 = vmatprep.subr.bf16.mxu0 %v533_v29  ;;  %336 = vmatprep.subr.bf16.mxu1 %v535_v30 }
  0x46   :  { %286 = vmatpush1.bf16.msra.mxu0 %v537_v31  ;;  %337 = vmatpush1.bf16.msra.mxu1 %v538_v32 }
  0x49   :  { %304 = vmatmul.mubr.bf16.vlgmr.msra.gmra.mrb[0].mxu0 %v539_v33  ;;  %355 = vmatmul.mubr.bf16.vlgmr.msra.gmra.mrb[0].mxu1 %v539_v33 }
  0x4a   :  { %313 = vmatprep.mubr.bf16.mxu0 %v619_v0  ;;  %364 = vmatprep.mubr.bf16.mxu1 %v619_v0 }
  0x51   :  { %314 = vmatmul.mubr.bf16.gmra.mrb[4].mxu0 %v540_v34  ;;  %365 = vmatmul.mubr.bf16.gmra.mrb[4].mxu1 %v540_v34 }
 0x11c   :  { %v305_v46 = vpop.f32.mrb[0].mxu0  ;;  %v356_v47 = vpop.f32.mrb[0].mxu1 }
 0x11d   :  { %v306_v48 = vadd.f32 %v305_v46, %v84_v42  ;;  %v357_v49 = vadd.f32 %v356_v47, %v92_v43  ;;  %v307_v50 = vpop.f32.mrb[1].mxu0  ;;  %v358_v51 = vpop.f32.mrb[1].mxu1 }
 0x11e   :  { %v308_v52 = vadd.f32 %v307_v50, %v88_v44  ;;  %v359_v53 = vadd.f32 %v358_v51, %v96_v45  ;;  %v309_v54 = vpop.f32.mrb[2].mxu0  ;;  %v360_v55 = vpop.f32.mrb[2].mxu1 }
 0x11f   :  { %v310_v56 = vadd.f32 %v309_v54, %v84_v42  ;;  %v361_v57 = vadd.f32 %v360_v55, %v92_v43  ;;  %v311_v58 = vpop.f32.mrb[3].mxu0  ;;  %v362_v59 = vpop.f32.mrb[3].mxu1 }
 0x120   :  { %v477_v60 = vpack.c.bf16 %v308_v52, %v306_v48  ;;  %v478_v61 = vpack.c.bf16 %v359_v53, %v357_v49  ;;  %v312_v62 = vadd.f32 %v311_v58, %v88_v44  ;;  %v363_v63 = vadd.f32 %v362_v59, %v96_v45 }
 0x122   :  { %413 = vst [vmem:[#allocation7] sm:$0xff] %v477_v60  ;;  %414 = vst [vmem:[#allocation7 + $0x8] sm:$0xff] %v478_v61  ;;  %v479_v0 = vpack.c.bf16 %v312_v62, %v310_v56  ;;  %v480_v1 = vpack.c.bf16 %v363_v63, %v361_v57 }
 0x124   :  { %415 = vst [vmem:[#allocation7 + $0x10] sm:$0xff] %v479_v0  ;;  %416 = vst [vmem:[#allocation7 + $0x18] sm:$0xff] %v480_v1  ;;  %v315_v2 = vpop.f32.mrb[4].mxu0  ;;  %v366_v3 = vpop.f32.mrb[4].mxu1 }
 0x125   :  { %v316_v4 = vadd.f32 %v315_v2, %v84_v42  ;;  %v367_v5 = vadd.f32 %v366_v3, %v92_v43  ;;  %v317_v6 = vpop.f32.mrb[5].mxu0  ;;  %v368_v7 = vpop.f32.mrb[5].mxu1 }
 0x126   :  { %v318_v8 = vadd.f32 %v317_v6, %v88_v44  ;;  %v369_v9 = vadd.f32 %v368_v7, %v96_v45  ;;  %v319_v10 = vpop.f32.mrb[6].mxu0  ;;  %v370_v11 = vpop.f32.mrb[6].mxu1 }
 0x127   :  { %v320_v12 = vpop.f32.mrb[7].mxu0  ;;  %v371_v13 = vpop.f32.mrb[7].mxu1 }
 0x128   :  { %v481_v14 = vpack.c.bf16 %v318_v8, %v316_v4  ;;  %v482_v15 = vpack.c.bf16 %v369_v9, %v367_v5 }
 0x12a   :  { %417 = vst [vmem:[#allocation7 + $0x20] sm:$0xff] %v481_v14  ;;  %418 = vst [vmem:[#allocation7 + $0x28] sm:$0xff] %v482_v15 }
 0x12b   :  { %596 = shalt.err (!%p593_p6)
}
 0x12c   :  { %s597_s17 = scalar_lea.hbm %s693_s3, 768 }
 0x12d   :  { %p598_p7 = scmp.ne.s32.totalorder %s693_s3, %s597_s17  ;;  %p601_p8 = scmp.lt.u32.totalorder %s597_s17, %s693_s3 }
 0x12f   :  { %p603_p9 = pnand %p601_p8, %p598_p7 }
 0x131   :  { %606 = shalt.err (!%p603_p9)
}
 0x132   :  { %430 = dma.vmem_to_hbm [thread:$0]  %s425_s13, 768, %s693_s3, [#allocation4], %s617_s0, %s617_s0, %s618_s9  }
 0x133   :  { %611 = dma.done.wait [#allocation4], 768  }
 0x134   :  { %612 = vsyncadd [#allocation4], 4294966528 }
 0x135   :  { %434 = vsyncpa [#allocation3], 1 }
 0x136   :  { %435 = vsyncpa [#allocation6], 1 }
 0x137   :  { %436 = vsyncpa [#allocation4], 1 }

</bundles_post_ra>
